<compile_context>
chip_gen: v7x
topology: tpu7x:2x2x1
jax: 0.10.0
libtpu: 0.0.40
codegen_flags: <defaults>
</compile_context>

<pallas_src>
import functools
import math

import jax
import jax.numpy as jnp
import numpy as np
from jax.experimental import pallas as pl
from jax.experimental.pallas import tpu as pltpu


# ----------------------------------------------------------------------------
# Kernel A: fused q/k projection (all entity types, bias folded) + RoPE.
# One grid step per batch element.
# ----------------------------------------------------------------------------
def _proj_rope_kernel(hT_ref, wb_ref, cos_ref, sin_ref, qT_ref, kT_ref,
                      *, ent, inner_dim):
    # hT_ref:  (1, H+1, L)   hidden states^T with a trailing ones row (bf16)
    # wb_ref:  (2*E*D, H+1)  fused rows [q rows | k rows] + bias column (bf16)
    # cos_ref: (D, L)        RoPE cos, rotate-half layout, transposed (f32)
    # sin_ref: (D, L)        RoPE sin
    # qT_ref:  (1, E*D, L)   RoPE'd q^T (1/sqrt(D) already folded in), bf16
    # kT_ref:  (1, E*D, L)   RoPE'd k^T, bf16
    E, D = ent, inner_dim
    Dh = D // 2
    ED = E * D

    # One wide canonical MXU matmul: (2ED, H+1) . (H+1, L) -> (2ED, L), f32 acc.
    p = jax.lax.dot_general(
        wb_ref[...], hT_ref[0],
        dimension_numbers=(((1,), (0,)), ((), ())),
        preferred_element_type=jnp.float32)

    cos = jnp.concatenate([cos_ref[...]] * E, axis=0)      # (ED, L)
    sin = jnp.concatenate([sin_ref[...]] * E, axis=0)      # (ED, L)

    def rope(x):  # x: (ED, L); rotate-half within each entity's D-row block.
        pieces = []
        for e in range(E):
            blk = x[e * D:(e + 1) * D, :]
            pieces.append(-blk[Dh:, :])
            pieces.append(blk[:Dh, :])
        return x * cos + jnp.concatenate(pieces, axis=0) * sin

    qT_ref[0] = rope(p[:ED, :]).astype(qT_ref.dtype)
    kT_ref[0] = rope(p[ED:, :]).astype(kT_ref.dtype)


# ----------------------------------------------------------------------------
# Kernel B: scores + masking for one (batch, entity, query-tile) output block.
# ----------------------------------------------------------------------------
def _score_kernel(q_ref, kT_ref, m_ref, o_ref, *, inner_dim, tq):
    # q_ref:  (1, 1, TQ, D)  bf16, RoPE'd, pre-scaled by 1/sqrt(D)
    # kT_ref: (1, 1, D, L)   bf16, RoPE'd
    # m_ref:  (1, 1, L)      f32 key-axis pad mask
    # o_ref:  (1, 1, TQ, L)  logits tile (bf16 by default)
    D = inner_dim
    qi = pl.program_id(2)

    # Canonical MXU matmul: (TQ, D) . (D, L) -> (TQ, L), f32 accumulation.
    s = jnp.dot(q_ref[0, 0], kT_ref[0, 0], preferred_element_type=jnp.float32)

    big = 1e12 / math.sqrt(D)            # masks applied post 1/sqrt(D) scaling
    pad = m_ref[0]                       # (1, L): broadcast along query rows
    s = s * pad + (pad - 1.0) * big

    shape = s.shape                      # (TQ, L)
    row = qi * tq + jax.lax.broadcasted_iota(jnp.int32, shape, 0)
    col = jax.lax.broadcasted_iota(jnp.int32, shape, 1)
    s = jnp.where(row > col, s - big, s)  # strict lower-triangular mask

    o_ref[0, 0] = s.astype(o_ref.dtype)


# ----------------------------------------------------------------------------
# VMEM budgeting helpers
# ----------------------------------------------------------------------------
def _nbytes(shape, dtype):
    return int(np.prod(shape)) * jnp.dtype(dtype).itemsize


def _lane(n):    # lane (last-dim) padding
    return max(128, ((n + 127) // 128) * 128)


def _sub(n):     # sublane padding
    return max(8, ((n + 7) // 8) * 8)


def _clamp_vmem(estimate):
    # Headroom under v7x's 64 MiB physical VMEM; v5e/v6e have 128 MiB.
    return int(min(max(estimate, 32 << 20), 48 << 20))


def _score_vmem_estimate(tq, L, D):
    Lp, Dp = _lane(L), _lane(D)
    blocks = (_nbytes((_sub(tq), Dp), jnp.bfloat16)       # q block
              + _nbytes((_sub(D), Lp), jnp.bfloat16)      # kT block
              + _nbytes((8, Lp), jnp.float32)             # pad-mask block
              + _nbytes((_sub(tq), Lp), jnp.bfloat16))    # out block
    temps = 6 * _nbytes((_sub(tq), Lp), jnp.float32)      # s, iotas, selects
    return 2 * blocks + temps                             # 2x double-buffering


def _proj_vmem_estimate(L, H, E, D):
    ED = E * D
    Lp, Hp = _lane(L), _lane(H + 1)
    blocks = (_nbytes((_sub(H + 1), Lp), jnp.bfloat16)        # hT block
              + _nbytes((_sub(2 * ED), Hp), jnp.bfloat16)     # fused weights
              + 2 * _nbytes((_sub(D), Lp), jnp.float32)       # cos, sin
              + 2 * _nbytes((_sub(ED), Lp), jnp.bfloat16))    # qT, kT outputs
    temps = 6 * _nbytes((_sub(2 * ED), Lp), jnp.float32)      # p, rot, rope
    return 2 * blocks + temps


def _pick_tq(L, D, budget=40 << 20):
    cands = []
    if L <= 512:
        cands.append(L)
    cands += [t for t in (512, 256, 128, 64, 32, 16, 8) if t < L and L % t == 0]
    if not cands:
        cands = [L]
    for tq in cands:
        if _score_vmem_estimate(tq, L, D) <= budget:
            return tq
    return cands[-1]


# ----------------------------------------------------------------------------
# Wrapper
# ----------------------------------------------------------------------------
def global_pointer_pallas(last_hidden_state, attention_mask, W, b,
                          ent_type_size, inner_dim, out_dtype=jnp.bfloat16):
    """last_hidden_state: [B, L, H]; attention_mask: [B, L].
    W: [ent*2D, H], b: [ent*2D]   (nn.Linear convention y = x W^T + b).
    Returns logits [B, ent, L, L] in `out_dtype` (bf16 by default: the kernel
    is HBM-writeback bound, so halving output bytes ~halves wall clock)."""
    B, L, H = last_hidden_state.shape
    E, D = ent_type_size, inner_dim
    Dh = D // 2
    ED = E * D
    assert D % 2 == 0 and W.shape == (2 * ED, H) and b.shape == (2 * ED,)
    # TODO(synk): for production L not a multiple of 128, pad L to the next
    # multiple of 128 here (lane-dense output stores) and slice the result.

    inv = 1.0 / math.sqrt(D)

    # Row permutation: [all q rows | all k rows], rotate-half (de-interleaved)
    # within each entity block.  q . k^T is invariant under the shared
    # permutation; 1/sqrt(D) is folded into the q rows/bias (RoPE is linear).
    deint = np.concatenate([np.arange(0, D, 2), np.arange(1, D, 2)])
    perm_q = np.concatenate([e * 2 * D + deint for e in range(E)])
    perm_k = np.concatenate([e * 2 * D + D + deint for e in range(E)])
    W32 = jnp.asarray(W, jnp.float32)
    b32 = jnp.asarray(b, jnp.float32)
    w_rows = jnp.concatenate([W32[perm_q] * inv, W32[perm_k]], axis=0)
    bias_col = jnp.concatenate([b32[perm_q] * inv, b32[perm_k]])[:, None]
    wb = jnp.concatenate([w_rows, bias_col], axis=1).astype(jnp.bfloat16)

    # Hidden states pre-transposed to (B, H+1, L) with a trailing ones row so
    # the bias rides inside the matmul (canonical MXU layout).
    hT = jnp.swapaxes(last_hidden_state.astype(jnp.float32), 1, 2)
    hT_aug = jnp.concatenate([hT, jnp.ones((B, 1, L), jnp.float32)],
                             axis=1).astype(jnp.bfloat16)            # (B,H+1,L)

    # RoPE tables in rotate-half layout, transposed to (D, L).
    pos = jnp.arange(L, dtype=jnp.float32)[None, :]                  # (1, L)
    freq = jnp.power(10000.0,
                     -2.0 * jnp.arange(Dh, dtype=jnp.float32) / D)[:, None]
    ang = freq * pos                                                 # (Dh, L)
    cos_d = jnp.tile(jnp.cos(ang), (2, 1))                           # (D, L)
    sin_d = jnp.tile(jnp.sin(ang), (2, 1))                           # (D, L)

    # --- kernel A: fused projection + RoPE, one grid step per batch ----------
    qT, kT = pl.pallas_call(
        functools.partial(_proj_rope_kernel, ent=E, inner_dim=D),
        out_shape=(jax.ShapeDtypeStruct((B, ED, L), jnp.bfloat16),
                   jax.ShapeDtypeStruct((B, ED, L), jnp.bfloat16)),
        grid_spec=pltpu.PrefetchScalarGridSpec(
            num_scalar_prefetch=0,
            grid=(B,),
            in_specs=[
                pl.BlockSpec((1, H + 1, L), lambda bi: (bi, 0, 0)),   # hidden^T
                pl.BlockSpec((2 * ED, H + 1), lambda bi: (0, 0)),     # fused W+b
                pl.BlockSpec((D, L), lambda bi: (0, 0)),              # cos
                pl.BlockSpec((D, L), lambda bi: (0, 0)),              # sin
            ],
            out_specs=(
                pl.BlockSpec((1, ED, L), lambda bi: (bi, 0, 0)),
                pl.BlockSpec((1, ED, L), lambda bi: (bi, 0, 0)),
            )),
        compiler_params=pltpu.CompilerParams(
            dimension_semantics=("parallel",),
            vmem_limit_bytes=_clamp_vmem(_proj_vmem_estimate(L, H, E, D))),
    )(hT_aug, wb, cos_d, sin_d)

    # Cheap XLA relayout (tiny vs the L^2 output): q -> (B, E, L, D) so the
    # score matmul is a canonical (TQ, D) x (D, L) contraction; k stays
    # feature-major (B, E, D, L) (pure reshape, no transpose).
    q4 = jnp.swapaxes(qT.reshape(B, E, D, L), 2, 3)                  # (B,E,L,D)
    k4 = kT.reshape(B, E, D, L)                                      # (B,E,D,L)
    mask3 = attention_mask.astype(jnp.float32).reshape(B, 1, L)

    TQ = _pick_tq(L, D)
    assert L % TQ == 0

    # --- kernel B: scores + masking; grid (B, E, query-tiles), all parallel --
    return pl.pallas_call(
        functools.partial(_score_kernel, inner_dim=D, tq=TQ),
        out_shape=jax.ShapeDtypeStruct((B, E, L, L), out_dtype),
        grid_spec=pltpu.PrefetchScalarGridSpec(
            num_scalar_prefetch=0,
            grid=(B, E, L // TQ),
            in_specs=[
                pl.BlockSpec((1, 1, TQ, D), lambda bi, ei, qi: (bi, ei, qi, 0)),
                pl.BlockSpec((1, 1, D, L), lambda bi, ei, qi: (bi, ei, 0, 0)),
                pl.BlockSpec((1, 1, L), lambda bi, ei, qi: (bi, 0, 0)),
            ],
            out_specs=pl.BlockSpec((1, 1, TQ, L),
                                   lambda bi, ei, qi: (bi, ei, qi, 0))),
        compiler_params=pltpu.CompilerParams(
            dimension_semantics=("parallel", "parallel", "parallel"),
            vmem_limit_bytes=_clamp_vmem(
                _score_vmem_estimate(TQ, L, D) + (8 << 20))),
    )(q4, k4, mask3)


# ----------------------------------------------------------------------------
# Pure-JAX reference (mirrors the PyTorch forward exactly) for sanity check.
# ----------------------------------------------------------------------------
def global_pointer_ref(last_hidden_state, attention_mask, W, b,
                       ent_type_size, inner_dim):
    B, L, H = last_hidden_state.shape
    D = inner_dim
    out = last_hidden_state @ W.T + b                            # (B, L, ent*2D)
    out = out.reshape(B, L, ent_type_size, 2 * D)
    qw, kw = out[..., :D], out[..., D:]

    pos = jnp.arange(L, dtype=jnp.float32)[:, None]
    idx = jnp.arange(D // 2, dtype=jnp.float32)
    theta = jnp.power(10000.0, -2.0 * idx / D)
    ang = pos * theta
    sin_pos = jnp.repeat(jnp.sin(ang), 2, axis=-1)[None, :, None, :]
    cos_pos = jnp.repeat(jnp.cos(ang), 2, axis=-1)[None, :, None, :]

    def rope(x):
        x2 = jnp.stack([-x[..., 1::2], x[..., ::2]], axis=-1).reshape(x.shape)
        return x * cos_pos + x2 * sin_pos

    qw, kw = rope(qw), rope(kw)
    logits = jnp.einsum('bmhd,bnhd->bhmn', qw, kw)
    pad = attention_mask.astype(jnp.float32)[:, None, None, :]   # key-axis mask
    logits = logits * pad - (1 - pad) * 1e12
    tril = jnp.tril(jnp.ones((L, L), jnp.float32), -1)[None, None]
    logits = logits - tril * 1e12
    return logits / math.sqrt(D)


# ----------------------------------------------------------------------------
if __name__ == "__main__":
    B, L, H = 2, 8, 32
    ENT, D = 4, 16
    VOCAB = 50

    key = jax.random.PRNGKey(0)
    k_emb, k_ids, k_w, k_b = jax.random.split(key, 4)

    # --- synthetic "encoder": deterministic embedding lookup (plain JAX glue)
    input_ids = jax.random.randint(k_ids, (B, L), 0, VOCAB)
    token_type_ids = jnp.zeros((B, L), jnp.int32)        # unused by hot path
    attention_mask = jnp.array(
        [[1] * L, [1] * (L - 2) + [0] * 2], dtype=jnp.float32)
    emb_table = jax.random.normal(k_emb, (VOCAB, H), jnp.float32) * 0.1
    last_hidden_state = emb_table[input_ids]             # (B, L, H)

    # --- dense layer parameters (PyTorch nn.Linear convention: y = x W^T + b)
    W = jax.random.normal(k_w, (ENT * 2 * D, H), jnp.float32) / math.sqrt(H)
    b = jax.random.normal(k_b, (ENT * 2 * D,), jnp.float32) * 0.01

    ref = global_pointer_ref(last_hidden_state, attention_mask, W, b, ENT, D)

    # Optimized path: bf16 logits (kernel is HBM-writeback bound).
    logits_bf16 = global_pointer_pallas(last_hidden_state, attention_mask,
                                        W, b, ENT, D, out_dtype=jnp.bfloat16)
    logits_bf16 = jax.block_until_ready(logits_bf16)
    np.testing.assert_allclose(
        np.asarray(logits_bf16.astype(jnp.float32)), np.asarray(ref),
        rtol=1e-2, atol=2e-2)

    # f32 parity path (same kernels, f32 epilogue store) for tighter check.
    logits_f32 = global_pointer_pallas(last_hidden_state, attention_mask,
                                       W, b, ENT, D, out_dtype=jnp.float32)
    logits_f32 = jax.block_until_ready(logits_f32)
    np.testing.assert_allclose(np.asarray(logits_f32), np.asarray(ref),
                               rtol=2e-3, atol=2e-2)

    print("KERNEL_OK")
</pallas_src>

<mosaic_0001>
module attributes {stable_mosaic.version = 11 : i64} {
  func.func @_proj_rope_kernel(%arg0: i32, %arg1: memref<1x33x8xbf16, #tpu.memory_space<vmem>>, %arg2: memref<128x33xbf16, #tpu.memory_space<vmem>>, %arg3: memref<16x8xf32, #tpu.memory_space<vmem>>, %arg4: memref<16x8xf32, #tpu.memory_space<vmem>>, %arg5: memref<1x64x8xbf16, #tpu.memory_space<vmem>>, %arg6: memref<1x64x8xbf16, #tpu.memory_space<vmem>>) attributes {dimension_semantics = [#tpu.dimension_semantics<parallel>], iteration_bounds = array<i64: 2>, scalar_prefetch = 0 : i64, scratch_operands = 0 : i64, tpu.core_type = #tpu.core_type<tc>, window_params = [{transform_indices = @transform_0, window_bounds = array<i64: 1, 33, 8>}, {pipeline_mode = #tpu.pipeline_mode<synchronous>, transform_indices = @transform_1, window_bounds = array<i64: 128, 33>}, {pipeline_mode = #tpu.pipeline_mode<synchronous>, transform_indices = @transform_2, window_bounds = array<i64: 16, 8>}, {pipeline_mode = #tpu.pipeline_mode<synchronous>, transform_indices = @transform_3, window_bounds = array<i64: 16, 8>}, {transform_indices = @transform_4, window_bounds = array<i64: 1, 64, 8>}, {transform_indices = @transform_5, window_bounds = array<i64: 1, 64, 8>}]} {
    %c0 = arith.constant 0 : index
    %c0_0 = arith.constant 0 : index
    %0 = vector.load %arg2[%c0, %c0_0] : memref<128x33xbf16, #tpu.memory_space<vmem>>, vector<128x33xbf16>
    %c0_1 = arith.constant 0 : index
    %c0_2 = arith.constant 0 : index
    %c0_3 = arith.constant 0 : index
    %1 = vector.load %arg1[%c0_1, %c0_2, %c0_3] : memref<1x33x8xbf16, #tpu.memory_space<vmem>>, vector<1x33x8xbf16>
    %2 = vector.shape_cast %1 : vector<1x33x8xbf16> to vector<33x8xbf16>
    %cst = arith.constant dense<0.000000e+00> : vector<128x8xf32>
    %3 = tpu.matmul %0, %2, %cst {dimension_numbers = #tpu.dot_dimension_numbers<[1], [0], [0], [1], [0, 0, 1, 1], [], []>} : vector<128x33xbf16>, vector<33x8xbf16>, vector<128x8xf32> -> vector<128x8xf32>
    %c0_4 = arith.constant 0 : index
    %c0_5 = arith.constant 0 : index
    %4 = vector.load %arg3[%c0_4, %c0_5] : memref<16x8xf32, #tpu.memory_space<vmem>>, vector<16x8xf32>
    %5 = tpu.concatenate %4, %4, %4, %4 in 0 : vector<16x8xf32>, vector<16x8xf32>, vector<16x8xf32>, vector<16x8xf32> -> vector<64x8xf32>
    %c0_6 = arith.constant 0 : index
    %c0_7 = arith.constant 0 : index
    %6 = vector.load %arg4[%c0_6, %c0_7] : memref<16x8xf32, #tpu.memory_space<vmem>>, vector<16x8xf32>
    %7 = tpu.concatenate %6, %6, %6, %6 in 0 : vector<16x8xf32>, vector<16x8xf32>, vector<16x8xf32>, vector<16x8xf32> -> vector<64x8xf32>
    %8 = vector.extract_strided_slice %3 {offsets = [0, 0], sizes = [64, 8], strides = [1, 1]} : vector<128x8xf32> to vector<64x8xf32>
    %9 = vector.extract_strided_slice %8 {offsets = [0, 0], sizes = [16, 8], strides = [1, 1]} : vector<64x8xf32> to vector<16x8xf32>
    %10 = vector.extract_strided_slice %9 {offsets = [8, 0], sizes = [8, 8], strides = [1, 1]} : vector<16x8xf32> to vector<8x8xf32>
    %cst_8 = arith.constant 0.000000e+00 : f32
    %11 = vector.broadcast %cst_8 : f32 to vector<8x8xf32>
    %12 = arith.subf %11, %10 : vector<8x8xf32>
    %13 = vector.extract_strided_slice %9 {offsets = [0, 0], sizes = [8, 8], strides = [1, 1]} : vector<16x8xf32> to vector<8x8xf32>
    %14 = vector.extract_strided_slice %8 {offsets = [16, 0], sizes = [16, 8], strides = [1, 1]} : vector<64x8xf32> to vector<16x8xf32>
    %15 = vector.extract_strided_slice %14 {offsets = [8, 0], sizes = [8, 8], strides = [1, 1]} : vector<16x8xf32> to vector<8x8xf32>
    %cst_9 = arith.constant 0.000000e+00 : f32
    %16 = vector.broadcast %cst_9 : f32 to vector<8x8xf32>
    %17 = arith.subf %16, %15 : vector<8x8xf32>
    %18 = vector.extract_strided_slice %14 {offsets = [0, 0], sizes = [8, 8], strides = [1, 1]} : vector<16x8xf32> to vector<8x8xf32>
    %19 = vector.extract_strided_slice %8 {offsets = [32, 0], sizes = [16, 8], strides = [1, 1]} : vector<64x8xf32> to vector<16x8xf32>
    %20 = vector.extract_strided_slice %19 {offsets = [8, 0], sizes = [8, 8], strides = [1, 1]} : vector<16x8xf32> to vector<8x8xf32>
    %cst_10 = arith.constant 0.000000e+00 : f32
    %21 = vector.broadcast %cst_10 : f32 to vector<8x8xf32>
    %22 = arith.subf %21, %20 : vector<8x8xf32>
    %23 = vector.extract_strided_slice %19 {offsets = [0, 0], sizes = [8, 8], strides = [1, 1]} : vector<16x8xf32> to vector<8x8xf32>
    %24 = vector.extract_strided_slice %8 {offsets = [48, 0], sizes = [16, 8], strides = [1, 1]} : vector<64x8xf32> to vector<16x8xf32>
    %25 = vector.extract_strided_slice %24 {offsets = [8, 0], sizes = [8, 8], strides = [1, 1]} : vector<16x8xf32> to vector<8x8xf32>
    %cst_11 = arith.constant 0.000000e+00 : f32
    %26 = vector.broadcast %cst_11 : f32 to vector<8x8xf32>
    %27 = arith.subf %26, %25 : vector<8x8xf32>
    %28 = vector.extract_strided_slice %24 {offsets = [0, 0], sizes = [8, 8], strides = [1, 1]} : vector<16x8xf32> to vector<8x8xf32>
    %29 = arith.mulf %8, %5 : vector<64x8xf32>
    %30 = tpu.concatenate %12, %13, %17, %18, %22, %23, %27, %28 in 0 : vector<8x8xf32>, vector<8x8xf32>, vector<8x8xf32>, vector<8x8xf32>, vector<8x8xf32>, vector<8x8xf32>, vector<8x8xf32>, vector<8x8xf32> -> vector<64x8xf32>
    %31 = arith.mulf %30, %7 : vector<64x8xf32>
    %32 = arith.addf %29, %31 : vector<64x8xf32>
    %33 = arith.truncf %32 : vector<64x8xf32> to vector<64x8xbf16>
    %c0_12 = arith.constant 0 : index
    %c0_13 = arith.constant 0 : index
    %c0_14 = arith.constant 0 : index
    %34 = vector.load %arg5[%c0_12, %c0_13, %c0_14] : memref<1x64x8xbf16, #tpu.memory_space<vmem>>, vector<1x64x8xbf16>
    %35 = vector.shape_cast %34 : vector<1x64x8xbf16> to vector<64x8xbf16>
    %36 = vector.shape_cast %33 : vector<64x8xbf16> to vector<1x64x8xbf16>
    tpu.vector_store %arg5[%c0_12, %c0_13, %c0_14], %36 {strides = array<i32>} : memref<1x64x8xbf16, #tpu.memory_space<vmem>>, vector<1x64x8xbf16>,
    %37 = vector.extract_strided_slice %3 {offsets = [64, 0], sizes = [64, 8], strides = [1, 1]} : vector<128x8xf32> to vector<64x8xf32>
    %38 = vector.extract_strided_slice %37 {offsets = [0, 0], sizes = [16, 8], strides = [1, 1]} : vector<64x8xf32> to vector<16x8xf32>
    %39 = vector.extract_strided_slice %38 {offsets = [8, 0], sizes = [8, 8], strides = [1, 1]} : vector<16x8xf32> to vector<8x8xf32>
    %cst_15 = arith.constant 0.000000e+00 : f32
    %40 = vector.broadcast %cst_15 : f32 to vector<8x8xf32>
    %41 = arith.subf %40, %39 : vector<8x8xf32>
    %42 = vector.extract_strided_slice %38 {offsets = [0, 0], sizes = [8, 8], strides = [1, 1]} : vector<16x8xf32> to vector<8x8xf32>
    %43 = vector.extract_strided_slice %37 {offsets = [16, 0], sizes = [16, 8], strides = [1, 1]} : vector<64x8xf32> to vector<16x8xf32>
    %44 = vector.extract_strided_slice %43 {offsets = [8, 0], sizes = [8, 8], strides = [1, 1]} : vector<16x8xf32> to vector<8x8xf32>
    %cst_16 = arith.constant 0.000000e+00 : f32
    %45 = vector.broadcast %cst_16 : f32 to vector<8x8xf32>
    %46 = arith.subf %45, %44 : vector<8x8xf32>
    %47 = vector.extract_strided_slice %43 {offsets = [0, 0], sizes = [8, 8], strides = [1, 1]} : vector<16x8xf32> to vector<8x8xf32>
    %48 = vector.extract_strided_slice %37 {offsets = [32, 0], sizes = [16, 8], strides = [1, 1]} : vector<64x8xf32> to vector<16x8xf32>
    %49 = vector.extract_strided_slice %48 {offsets = [8, 0], sizes = [8, 8], strides = [1, 1]} : vector<16x8xf32> to vector<8x8xf32>
    %cst_17 = arith.constant 0.000000e+00 : f32
    %50 = vector.broadcast %cst_17 : f32 to vector<8x8xf32>
    %51 = arith.subf %50, %49 : vector<8x8xf32>
    %52 = vector.extract_strided_slice %48 {offsets = [0, 0], sizes = [8, 8], strides = [1, 1]} : vector<16x8xf32> to vector<8x8xf32>
    %53 = vector.extract_strided_slice %37 {offsets = [48, 0], sizes = [16, 8], strides = [1, 1]} : vector<64x8xf32> to vector<16x8xf32>
    %54 = vector.extract_strided_slice %53 {offsets = [8, 0], sizes = [8, 8], strides = [1, 1]} : vector<16x8xf32> to vector<8x8xf32>
    %cst_18 = arith.constant 0.000000e+00 : f32
    %55 = vector.broadcast %cst_18 : f32 to vector<8x8xf32>
    %56 = arith.subf %55, %54 : vector<8x8xf32>
    %57 = vector.extract_strided_slice %53 {offsets = [0, 0], sizes = [8, 8], strides = [1, 1]} : vector<16x8xf32> to vector<8x8xf32>
    %58 = arith.mulf %37, %5 : vector<64x8xf32>
    %59 = tpu.concatenate %41, %42, %46, %47, %51, %52, %56, %57 in 0 : vector<8x8xf32>, vector<8x8xf32>, vector<8x8xf32>, vector<8x8xf32>, vector<8x8xf32>, vector<8x8xf32>, vector<8x8xf32>, vector<8x8xf32> -> vector<64x8xf32>
    %60 = arith.mulf %59, %7 : vector<64x8xf32>
    %61 = arith.addf %58, %60 : vector<64x8xf32>
    %62 = arith.truncf %61 : vector<64x8xf32> to vector<64x8xbf16>
    %c0_19 = arith.constant 0 : index
    %c0_20 = arith.constant 0 : index
    %c0_21 = arith.constant 0 : index
    %63 = vector.load %arg6[%c0_19, %c0_20, %c0_21] : memref<1x64x8xbf16, #tpu.memory_space<vmem>>, vector<1x64x8xbf16>
    %64 = vector.shape_cast %63 : vector<1x64x8xbf16> to vector<64x8xbf16>
    %65 = vector.shape_cast %62 : vector<64x8xbf16> to vector<1x64x8xbf16>
    tpu.vector_store %arg6[%c0_19, %c0_20, %c0_21], %65 {strides = array<i32>} : memref<1x64x8xbf16, #tpu.memory_space<vmem>>, vector<1x64x8xbf16>,
    return
  }
  func.func @transform_0(%arg0: i32) -> (i32, i32, i32) {
    %c0_i32 = arith.constant 0 : i32
    %c0_i32_0 = arith.constant 0 : i32
    %c0_i32_1 = arith.constant 0 : i32
    return %arg0, %c0_i32, %c0_i32_0 : i32, i32, i32
  }
  func.func @transform_1(%arg0: i32) -> (i32, i32) {
    %c0_i32 = arith.constant 0 : i32
    %c0_i32_0 = arith.constant 0 : i32
    %c0_i32_1 = arith.constant 0 : i32
    return %c0_i32, %c0_i32_0 : i32, i32
  }
  func.func @transform_2(%arg0: i32) -> (i32, i32) {
    %c0_i32 = arith.constant 0 : i32
    %c0_i32_0 = arith.constant 0 : i32
    %c0_i32_1 = arith.constant 0 : i32
    return %c0_i32, %c0_i32_0 : i32, i32
  }
  func.func @transform_3(%arg0: i32) -> (i32, i32) {
    %c0_i32 = arith.constant 0 : i32
    %c0_i32_0 = arith.constant 0 : i32
    %c0_i32_1 = arith.constant 0 : i32
    return %c0_i32, %c0_i32_0 : i32, i32
  }
  func.func @transform_4(%arg0: i32) -> (i32, i32, i32) {
    %c0_i32 = arith.constant 0 : i32
    %c0_i32_0 = arith.constant 0 : i32
    %c0_i32_1 = arith.constant 0 : i32
    return %arg0, %c0_i32, %c0_i32_0 : i32, i32, i32
  }
  func.func @transform_5(%arg0: i32) -> (i32, i32, i32) {
    %c0_i32 = arith.constant 0 : i32
    %c0_i32_0 = arith.constant 0 : i32
    %c0_i32_1 = arith.constant 0 : i32
    return %arg0, %c0_i32, %c0_i32_0 : i32, i32, i32
  }
}

</mosaic_0001>

<bundles_post_ra>
// kernel: tpu_custom_call.1
= control target key start
LH: loop header
LB: loop body
LE: loop exit
PB: predicated region body
PF: predicated region fallthrough
CT: control target
= control target key end

     0   :  { %s836_s18 = smov 0   ;;  %s980_s0 = inlined_call_operand.vmem [shape: bf16[2,33,8], index: 0, kind: input, shape index: {}]   ;;  %s981_s1 = inlined_call_operand.vmem [shape: bf16[128,33], index: 1, kind: input, shape index: {}]   ;;  %s982_s2 = inlined_call_operand.vmem [shape: f32[16,8], index: 2, kind: input, shape index: {}]   ;;  %s983_s3 = inlined_call_operand.vmem [shape: f32[16,8], index: 3, kind: input, shape index: {}]   ;;  %s984_s4 = inlined_call_operand.vmem [shape: bf16[2,64,8], index: 4, kind: output, shape index: {0}]   ;;  %s985_s5 = inlined_call_operand.vmem [shape: bf16[2,64,8], index: 5, kind: output, shape index: {1}]  }
   0x1 LB: > { %s672_s19 = sadd.s32 4294967295, %s803_s18   ;;  %p676_p0 = scmp.ge.s32.totalorder %s803_s18, 1  ;;  %s803_s18 = sphi %s836_s18, %s16_s18  }
   0x2   : > { %p190_p1 = scmp.lt.s32.totalorder %s803_s18, 3 }
   0x4   : > { %p191_p2 = pnand %p676_p0, %p190_p1 }
   0x5   : > { %p223_p3 = scmp.lt.s32.totalorder (!%p191_p2), %s672_s19, 1  ;;  %v789_v0 = vld [vmem:[%s981_s1] sm:$0xff] (!%p191_p2)   ;;  %vm315_vm0 = vcmask (!%p191_p2), 269312   ;;  %vm340_vm1 = vcmask (!%p191_p2), 1040384   ;;  %v805_v4 = vmov (!%p191_p2), 0   ;;  %v791_v8 = vld [vmem:[%s981_s1 + $0x8] sm:$0xff] (!%p191_p2)  }
   0x6   : > { %194 = sbr.rel (%p191_p2) target bundleno = 264 (0x108), region = 36  ;;  %754 = vmatprep.mubr.msk.bf16.mxu0 (!%p191_p2), %vm315_vm0, %v789_v0  ;;  %v790_v1 = vld [vmem:[%s981_s1 + $0x20] sm:$0xff] (!%p191_p2)   ;;  %v342_v5 = vsel (!%p191_p2), %vm340_vm1, 65535, %v805_v4  ;;  %v792_v9 = vld [vmem:[%s981_s1 + $0x28] sm:$0xff] (!%p191_p2)   ;;  %v793_v10 = vld [vmem:[%s981_s1 + $0x10] sm:$0xff] (!%p191_p2)   ;;  %vm507_vm2 = vcmask (!%p191_p2), 60416  }
   0x7   : > { %762 = vmatprep.mubr.msk.bf16.mxu1 (!%p191_p2), %vm315_vm0, %v790_v1  ;;  %v794_v11 = vld [vmem:[%s981_s1 + $0x30] sm:$0xff] (!%p191_p2)   ;;  %v795_v12 = vld [vmem:[%s981_s1 + $0x18] sm:$0xff] (!%p191_p2)   ;;  %v885_v14 = vld [vmem:[%s982_s2] sm:$0xff] (!%p191_p2) }
   0x8   : > { %v796_v13 = vld [vmem:[%s981_s1 + $0x38] sm:$0xff] (!%p191_p2)   ;;  %v890_v15 = vld [vmem:[%s983_s3 + $0x8] sm:$0xff] (!%p191_p2)  ;;  %v908_v30 = vld [vmem:[%s983_s3] sm:$0xff] (!%p191_p2) }
   0x9   : > { %v895_v18 = vld [vmem:[%s982_s2 + $0x8] sm:$0xff] (!%p191_p2) }
   0xd   : > { %s987_s19 = smov (!%p223_p3, %s672_s19), 1 }
   0xe   : > { %s776_s24 = smul.u32 20, %s987_s19  ;;  %s719_s25 = sshll.u32 %s987_s19, 5 }
   0xf   : > { %s925_s30 = scalar_lea.vmem %s985_s5, %s719_s25 }
  0x10   : > { %s227_s27 = scalar_lea.vmem %s980_s0, %s776_s24 }
  0x11   : > { %v786_v2 = vld [vmem:[%s227_s27] sm:$0xff]   ;;  %v787_v3 = vld [vmem:[%s227_s27 + $0x8] sm:$0xff]   ;;  %v788_v6 = vld [vmem:[%s227_s27 + $0x10] ss:$0 sps:$4 sm:$0x11]   ;;  %s920_s27 = scalar_lea.vmem %s984_s4, %s719_s25 }
  0x12   : > { %748 = vmatprep.subr.bf16.mxu0 %v786_v2  ;;  %770 = vmatprep.subr.bf16.mxu1 %v786_v2  ;;  %v344_v7 = vand.u32 %v788_v6, %v342_v5 }
  0x13   : > { %749 = vmatpush3.bf16.msra.mxu0 %v786_v2  ;;  %773 = vmatpush3.bf16.msra.mxu1 %v786_v2 }
  0x14   : > { %750 = vmatprep.subr.bf16.mxu0 %v787_v3  ;;  %771 = vmatprep.subr.bf16.mxu1 %v787_v3 }
  0x17   : > { %751 = vmatpush3.bf16.msra.mxu0 %v787_v3  ;;  %774 = vmatpush3.bf16.msra.mxu1 %v787_v3 }
  0x18   : > { %752 = vmatprep.subr.bf16.mxu0 %v344_v7  ;;  %772 = vmatprep.subr.bf16.mxu1 %v344_v7 }
  0x1b   : > { %753 = vmatpush3.bf16.msra.mxu0 %v344_v7  ;;  %775 = vmatpush3.bf16.msra.mxu1 %v344_v7 }
  0x1e   : > { %755 = vmatmul.mubr.msk.bf16.vlgmr.msra.gmra.mrb[0].mxu0 %vm315_vm0, %v791_v8  ;;  %763 = vmatmul.mubr.msk.bf16.vlgmr.msra.gmra.mrb[0].mxu1 %vm315_vm0, %v792_v9 }
  0x1f   : > { %758 = vmatprep.mubr.msk.bf16.mxu0 %vm315_vm0, %v793_v10  ;;  %766 = vmatprep.mubr.msk.bf16.mxu1 %vm315_vm0, %v794_v11 }
  0x26   : > { %759 = vmatmul.mubr.msk.bf16.gmra.mrb[4].mxu0 %vm315_vm0, %v795_v12  ;;  %767 = vmatmul.mubr.msk.bf16.gmra.mrb[4].mxu1 %vm315_vm0, %v796_v13 }
  0xf1   : > { %v756_v16 = vpop.f32.mrb[0].mxu0  ;;  %v764_v17 = vpop.f32.mrb[0].mxu1 }
  0xf2   : > { %v453_v19 = vmul.f32 %v756_v16, %v885_v14  ;;  %v462_v20 = vmul.f32 %v756_v16, %v890_v15  ;;  %v522_v21 = vmul.f32 %v764_v17, %v885_v14  ;;  %v531_v22 = vmul.f32 %v764_v17, %v890_v15  ;;  %v380_v23 = vpop.f32.mrb[1].mxu0  ;;  %v412_v24 = vpop.f32.mrb[1].mxu1 }
  0xf3   : > { %v451_v25 = vmul.f32 %v885_v14, %v380_v23  ;;  %v460_v26 = vmul.f32 %v890_v15, %v380_v23  ;;  %v520_v27 = vmul.f32 %v885_v14, %v412_v24  ;;  %v529_v28 = vmul.f32 %v890_v15, %v412_v24  ;;  %v757_v29 = vpop.f32.mrb[2].mxu0  ;;  %v765_v31 = vpop.f32.mrb[2].mxu1 }
  0xf4   : > { %v448_v32 = vsub.f32 0.0, %v757_v29  ;;  %v454_v33 = vmul.f32 %v757_v29, %v895_v18  ;;  %v517_v34 = vsub.f32 0.0, %v765_v31  ;;  %v523_v35 = vmul.f32 %v765_v31, %v895_v18  ;;  %v383_v36 = vpop.f32.mrb[3].mxu0  ;;  %v415_v37 = vpop.f32.mrb[3].mxu1 }
  0xf5   : > { %v447_v38 = vsub.f32 0.0, %v383_v36  ;;  %v452_v39 = vmul.f32 %v895_v18, %v383_v36  ;;  %v516_v40 = vsub.f32 0.0, %v415_v37  ;;  %v521_v41 = vmul.f32 %v895_v18, %v415_v37 }
  0xf6   : > { %v461_v42 = vmul.f32 %v448_v32, %v908_v30  ;;  %v470_v43 = vadd.f32 %v462_v20, %v454_v33  ;;  %v530_v44 = vmul.f32 %v517_v34, %v908_v30  ;;  %v539_v45 = vadd.f32 %v531_v22, %v523_v35 }
  0xf7   : > { %v459_v46 = vmul.f32 %v447_v38, %v908_v30  ;;  %v468_v47 = vadd.f32 %v460_v26, %v452_v39  ;;  %v528_v48 = vmul.f32 %v516_v40, %v908_v30  ;;  %v537_v49 = vadd.f32 %v529_v28, %v521_v41 }
  0xf8   : > { %v469_v50 = vadd.f32 %v461_v42, %v453_v19  ;;  %v724_v51 = vpack.c.bf16 %v470_v43, %v470_v43  ;;  %v538_v52 = vadd.f32 %v530_v44, %v522_v21  ;;  %v732_v53 = vpack.c.bf16 %v539_v45, %v539_v45 }
  0xf9   : > { %v467_v54 = vadd.f32 %v459_v46, %v451_v25  ;;  %v722_v55 = vpack.c.bf16 %v468_v47, %v468_v47  ;;  %v536_v56 = vadd.f32 %v528_v48, %v520_v27  ;;  %v730_v57 = vpack.c.bf16 %v537_v49, %v537_v49  ;;  %v760_v58 = vpop.f32.mrb[4].mxu0  ;;  %v768_v59 = vpop.f32.mrb[4].mxu1 }
  0xfa   : > { %v723_v60 = vpack.c.bf16 %v469_v50, %v469_v50  ;;  %511 = vst.msk [vmem:[%s920_s27 + $0xc] sm:$0xf] %vm507_vm2, %v724_v51  ;;  %v731_v61 = vpack.c.bf16 %v538_v52, %v538_v52  ;;  %579 = vst.msk [vmem:[%s925_s30 + $0xc] sm:$0xf] %vm507_vm2, %v732_v53  ;;  %v457_v62 = vmul.f32 %v760_v58, %v885_v14  ;;  %v396_v0 = vpop.f32.mrb[5].mxu0  ;;  %v428_v1 = vpop.f32.mrb[5].mxu1 }
  0xfb   : > { %v466_v63 = vmul.f32 %v760_v58, %v890_v15  ;;  %v721_v2 = vpack.c.bf16 %v467_v54, %v467_v54  ;;  %509 = vst.msk [vmem:[%s920_s27 + $0x4] sm:$0xf] %vm507_vm2, %v722_v55  ;;  %v729_v3 = vpack.c.bf16 %v536_v56, %v536_v56  ;;  %577 = vst.msk [vmem:[%s925_s30 + $0x4] sm:$0xf] %vm507_vm2, %v730_v57  ;;  %v761_v6 = vpop.f32.mrb[6].mxu0  ;;  %v769_v7 = vpop.f32.mrb[6].mxu1 }
  0xfc   : > { %v526_v4 = vmul.f32 %v768_v59, %v885_v14  ;;  %v535_v5 = vmul.f32 %v768_v59, %v890_v15  ;;  %510 = vst.msk [vmem:[%s920_s27 + $0x8] sm:$0xf] %vm507_vm2, %v723_v60  ;;  %578 = vst.msk [vmem:[%s925_s30 + $0x8] sm:$0xf] %vm507_vm2, %v731_v61  ;;  %v455_v8 = vmul.f32 %v885_v14, %v396_v0  ;;  %v399_v12 = vpop.f32.mrb[7].mxu0  ;;  %v431_v13 = vpop.f32.mrb[7].mxu1 }
  0xfd   : > { %v464_v9 = vmul.f32 %v890_v15, %v396_v0  ;;  %v524_v10 = vmul.f32 %v885_v14, %v428_v1  ;;  %v533_v11 = vmul.f32 %v890_v15, %v428_v1  ;;  %508 = vst.msk [vmem:[%s920_s27] sm:$0xf] %vm507_vm2, %v721_v2  ;;  %576 = vst.msk [vmem:[%s925_s30] sm:$0xf] %vm507_vm2, %v729_v3  ;;  %v450_v16 = vsub.f32 0.0, %v761_v6 }
  0xfe   : > { %v458_v17 = vmul.f32 %v761_v6, %v895_v18  ;;  %v519_v19 = vsub.f32 0.0, %v769_v7  ;;  %v527_v20 = vmul.f32 %v769_v7, %v895_v18  ;;  %v449_v21 = vsub.f32 0.0, %v399_v12 }
  0xff   : > { %v456_v22 = vmul.f32 %v895_v18, %v399_v12  ;;  %v518_v23 = vsub.f32 0.0, %v431_v13  ;;  %v525_v14 = vmul.f32 %v895_v18, %v431_v13  ;;  %v465_v15 = vmul.f32 %v450_v16, %v908_v30 }
 0x100   : > { %v474_v24 = vadd.f32 %v466_v63, %v458_v17  ;;  %v534_v25 = vmul.f32 %v519_v19, %v908_v30  ;;  %v543_v26 = vadd.f32 %v535_v5, %v527_v20  ;;  %v463_v27 = vmul.f32 %v449_v21, %v908_v30 }
 0x101   : > { %v472_v28 = vadd.f32 %v464_v9, %v456_v22  ;;  %v532_v29 = vmul.f32 %v518_v23, %v908_v30  ;;  %v541_v31 = vadd.f32 %v533_v11, %v525_v14  ;;  %v473_v32 = vadd.f32 %v465_v15, %v457_v62 }
 0x102   : > { %v728_v33 = vpack.c.bf16 %v474_v24, %v474_v24  ;;  %v542_v18 = vadd.f32 %v534_v25, %v526_v4  ;;  %v736_v34 = vpack.c.bf16 %v543_v26, %v543_v26  ;;  %v471_v35 = vadd.f32 %v463_v27, %v455_v8 }
 0x103   : > { %v726_v36 = vpack.c.bf16 %v472_v28, %v472_v28  ;;  %v540_v37 = vadd.f32 %v532_v29, %v524_v10  ;;  %v734_v38 = vpack.c.bf16 %v541_v31, %v541_v31  ;;  %v727_v39 = vpack.c.bf16 %v473_v32, %v473_v32 }
 0x104   : > { %515 = vst.msk [vmem:[%s920_s27 + $0x1c] sm:$0xf] %vm507_vm2, %v728_v33  ;;  %v735_v40 = vpack.c.bf16 %v542_v18, %v542_v18  ;;  %583 = vst.msk [vmem:[%s925_s30 + $0x1c] sm:$0xf] %vm507_vm2, %v736_v34  ;;  %v725_v30 = vpack.c.bf16 %v471_v35, %v471_v35 }
 0x105   : > { %513 = vst.msk [vmem:[%s920_s27 + $0x14] sm:$0xf] %vm507_vm2, %v726_v36  ;;  %v733_v41 = vpack.c.bf16 %v540_v37, %v540_v37  ;;  %581 = vst.msk [vmem:[%s925_s30 + $0x14] sm:$0xf] %vm507_vm2, %v734_v38 }
 0x106   : > { %514 = vst.msk [vmem:[%s920_s27 + $0x18] sm:$0xf] %vm507_vm2, %v727_v39  ;;  %582 = vst.msk [vmem:[%s925_s30 + $0x18] sm:$0xf] %vm507_vm2, %v735_v40 }
 0x107   : > { %512 = vst.msk [vmem:[%s920_s27 + $0x10] sm:$0xf] %vm507_vm2, %v725_v30  ;;  %580 = vst.msk [vmem:[%s925_s30 + $0x10] sm:$0xf] %vm507_vm2, %v733_v41 }
 0x108 PF: > { %s16_s18 = sadd.s32 1, %s803_s18  }
 0x109   : > { %p13_p4 = scmp.ge.s32.totalorder %s16_s18, 4  }
 0x10b   :  { %15 = sbr.rel (!%p13_p4) target bundleno = 1 (0x1), region = 78 }

</bundles_post_ra>
